<compile_context>
chip_gen: v6e
topology: v6e:2x2x1
jax: 0.10.0
libtpu: 0.0.40
codegen_flags: <defaults>
</compile_context>

<pallas_src>
import functools

import numpy as np
import jax
import jax.numpy as jnp
from jax.experimental import pallas as pl
from jax.experimental.pallas import tpu as pltpu

_LANE = 128                # lane-dense padded hidden width
_MEGACORE_MIN_ROWS = 1024  # below this, don't bother splitting the batch in two


def _round_up(n, m):
    return ((n + m - 1) // m) * m


def _elu_f32(x):
    # ELU, alpha=1.0 (PyTorch default). Clamp the exp argument so the discarded
    # branch of the select never produces inf.
    return jnp.where(x > 0, x, jnp.exp(jnp.minimum(x, 0.0)) - 1.0)


# -----------------------------------------------------------------------------
# Kernel
# -----------------------------------------------------------------------------

def actor_kernel(x_ref, w1_ref, b1_ref, w2_ref, b2_ref, w3_ref, b3_ref, o_ref):
    # In-kernel cast to the weight dtype (avoids a separate wrapper astype pass).
    x = x_ref[...].astype(w1_ref.dtype)                                # (TB, obs)

    h1 = jnp.dot(x, w1_ref[...], preferred_element_type=jnp.float32)
    h1 = _elu_f32(h1 + b1_ref[...].astype(jnp.float32))                # (TB, 128) f32

    h2 = jnp.dot(h1.astype(w2_ref.dtype), w2_ref[...],
                 preferred_element_type=jnp.float32)
    h2 = _elu_f32(h2 + b2_ref[...].astype(jnp.float32))                # (TB, 128) f32

    out = jnp.dot(h2.astype(w3_ref.dtype), w3_ref[...],
                  preferred_element_type=jnp.float32)
    out = out + b3_ref[...].astype(jnp.float32)                        # (TB, 128) f32

    # Narrow store: only the real action_dim columns go back to HBM (the output
    # stream dominates HBM traffic for this kernel).
    o_ref[...] = out[:, : o_ref.shape[1]].astype(o_ref.dtype)


# -----------------------------------------------------------------------------
# One-time parameter prep (outside the hot path)
# -----------------------------------------------------------------------------

def prepare_params(params, dtype=jnp.float32):
    """Transpose torch-style (out,in) weights to (in,out) and zero-pad the
    hidden feature dims to 128 lanes. dtype=jnp.bfloat16 halves weight /
    activation traffic and uses the bf16-native MXU (matmuls still accumulate
    in f32); padding is numerically inert (ELU(0)=0, padded W rows/b are 0)."""
    obs_dim = params["w1"].shape[1]
    action_dim = params["w3"].shape[0]

    def pad2d(a, shape):
        buf = jnp.zeros(shape, dtype)
        return buf.at[: a.shape[0], : a.shape[1]].set(a.astype(dtype))

    return {
        "w1": pad2d(params["w1"].T, (obs_dim, _LANE)),       # (obs, 128)
        "b1": pad2d(params["b1"].reshape(1, -1), (1, _LANE)),
        "w2": pad2d(params["w2"].T, (_LANE, _LANE)),         # (128, 128)
        "b2": pad2d(params["b2"].reshape(1, -1), (1, _LANE)),
        "w3": pad2d(params["w3"].T, (_LANE, _LANE)),         # (128, 128)
        "b3": pad2d(params["b3"].reshape(1, -1), (1, _LANE)),
        "obs_dim": obs_dim,
        "action_dim": action_dim,
        "dtype": dtype,
    }


# -----------------------------------------------------------------------------
# pallas_call wrapper
# -----------------------------------------------------------------------------

def _vmem_limit_bytes(tb, x_itemsize, out_itemsize, w_itemsize, obs_dim):
    io = 2 * tb * _LANE * (x_itemsize + out_itemsize)          # double-buffered x / out tiles (lane-padded)
    wts = 2 * ((obs_dim + 2 * _LANE + 3) * _LANE) * w_itemsize  # resident weights + biases (x2 buffers)
    tmp = 2 * tb * _LANE * 4                                    # h1 / h2 f32 temporaries
    need = io + wts + tmp + (4 << 20)                           # compiler headroom
    # Floor at the common scoped default, cap well under v7x's 64 MiB physical.
    return int(min(max(need, 16 << 20), 56 << 20))


@functools.partial(jax.jit, static_argnames=("tb", "action_dim", "out_dtype"))
def _actor_call(x, w1, b1, w2, b2, w3, b3, *, tb, action_dim, out_dtype):
    batch, obs_dim = x.shape
    grid = (pl.cdiv(batch, tb),)   # ragged last block: OOB reads unused, writes masked

    x_spec = pl.BlockSpec((tb, obs_dim), lambda i: (i, 0))
    out_spec = pl.BlockSpec((tb, action_dim), lambda i: (i, 0))
    # Weights / biases: full-array blocks with a constant block index -> they
    # stay VMEM-resident across the whole grid.
    const = lambda shape: pl.BlockSpec(shape, lambda i: (0, 0))

    vmem_limit = _vmem_limit_bytes(
        tb,
        x.dtype.itemsize,
        np.dtype(out_dtype).itemsize,
        w1.dtype.itemsize,
        obs_dim,
    )

    return pl.pallas_call(
        actor_kernel,
        out_shape=jax.ShapeDtypeStruct((batch, action_dim), out_dtype),
        grid=grid,
        in_specs=[
            x_spec,
            const(w1.shape), const(b1.shape),
            const(w2.shape), const(b2.shape),
            const(w3.shape), const(b3.shape),
        ],
        out_specs=out_spec,
        compiler_params=pltpu.CompilerParams(
            # "parallel" lets the compiler shard the batch grid across v7x's
            # 2 TensorCores (pltpu.CORE_PARALLEL is the stronger hint if
            # profiling shows the split is not happening).
            dimension_semantics=("parallel",),
            vmem_limit_bytes=vmem_limit,
        ),
    )(x, w1, b1, w2, b2, w3, b3)


def _pick_tb(batch, tb):
    tb = _round_up(max(tb, 8), 8)
    if batch > tb:
        return tb
    if batch >= _MEGACORE_MIN_ROWS:
        # Keep >=2 grid steps so both v7x TensorCores get work.
        return _round_up((batch + 1) // 2, 8)
    return batch   # single full-batch block (block dims == array dims is legal)


def actor_forward(x, prep, tb=2048, out_dtype=None):
    """x: (batch, obs_dim), any float dtype. prep: output of prepare_params().
    Returns (batch, action_dim) in `out_dtype` (default: prep's dtype)."""
    batch, obs_dim = x.shape
    assert obs_dim == prep["obs_dim"]
    if out_dtype is None:
        out_dtype = prep["dtype"]

    tb_eff = _pick_tb(batch, tb)
    return _actor_call(
        x, prep["w1"], prep["b1"], prep["w2"], prep["b2"], prep["w3"], prep["b3"],
        tb=tb_eff, action_dim=prep["action_dim"], out_dtype=out_dtype)


# -----------------------------------------------------------------------------
# Reference / test harness
# -----------------------------------------------------------------------------

def init_params(key, obs_dim, action_dim):
    """Synthetic init mimicking torch.nn.Linear default (uniform +/- 1/sqrt(fan_in))."""
    ks = jax.random.split(key, 6)

    def linear(kw, kb, fan_in, fan_out):
        bound = 1.0 / jnp.sqrt(fan_in)
        w = jax.random.uniform(kw, (fan_out, fan_in), jnp.float32, -bound, bound)
        b = jax.random.uniform(kb, (fan_out,), jnp.float32, -bound, bound)
        return w, b

    w1, b1 = linear(ks[0], ks[1], obs_dim, 64)
    w2, b2 = linear(ks[2], ks[3], 64, 64)
    w3, b3 = linear(ks[4], ks[5], 64, action_dim)
    return {"w1": w1, "b1": b1, "w2": w2, "b2": b2, "w3": w3, "b3": b3}


def actor_reference(x, p):
    elu = lambda v: jnp.where(v > 0, v, jnp.exp(jnp.minimum(v, 0.0)) - 1.0)
    h1 = elu(x @ p["w1"].T + p["b1"])
    h2 = elu(h1 @ p["w2"].T + p["b2"])
    return h2 @ p["w3"].T + p["b3"]


if __name__ == "__main__":
    obs_dim, action_dim = 32, 8

    key = jax.random.PRNGKey(0)
    kx, kp, kx2 = jax.random.split(key, 3)
    params = init_params(kp, obs_dim, action_dim)

    # ---------- f32 path ----------
    prep = prepare_params(params, dtype=jnp.float32)

    # Small batch: single full-batch block.
    x_small = jax.random.normal(kx, (8, obs_dim), jnp.float32)
    out_small = actor_forward(x_small, prep)
    jax.block_until_ready(out_small)
    ref_small = actor_reference(x_small, params)
    assert out_small.shape == (8, action_dim)
    assert jnp.allclose(out_small, ref_small, atol=1e-5, rtol=1e-5), \
        "small-batch mismatch vs reference"

    # Larger, non-multiple-of-8 batch, still a single block (no pad/slice passes).
    x_big = jax.random.normal(kx2, (1000, obs_dim), jnp.float32)
    out_big = actor_forward(x_big, prep)
    jax.block_until_ready(out_big)
    ref_big = actor_reference(x_big, params)
    assert out_big.shape == (1000, action_dim)
    assert jnp.allclose(out_big, ref_big, atol=1e-5, rtol=1e-5), \
        "large-batch mismatch vs reference"

    # Multi-step grid with a ragged (masked) last block: grid = cdiv(1000, 256) = 4.
    out_tiled = actor_forward(x_big, prep, tb=256)
    jax.block_until_ready(out_tiled)
    assert jnp.allclose(out_tiled, ref_big, atol=1e-5, rtol=1e-5), \
        "tiled/ragged-grid mismatch vs reference"

    # ---------- bf16 weight/activation path (f32 accumulation, bf16 output) ----------
    prep_bf16 = prepare_params(params, dtype=jnp.bfloat16)
    out_bf16 = actor_forward(x_big, prep_bf16)
    jax.block_until_ready(out_bf16)
    assert out_bf16.shape == (1000, action_dim)
    assert out_bf16.dtype == jnp.bfloat16
    diff = jnp.max(jnp.abs(out_bf16.astype(jnp.float32) - ref_big))
    assert bool(jnp.isfinite(diff)) and float(diff) < 0.25, \
        "bf16 path diverged too far from f32 reference"

    print("KERNEL_OK")
</pallas_src>

<mosaic_0001>
module attributes {stable_mosaic.version = 11 : i64} {
  func.func @actor_kernel(%arg0: i32, %arg1: memref<8x32xf32, #tpu.memory_space<vmem>>, %arg2: memref<32x128xf32, #tpu.memory_space<vmem>>, %arg3: memref<1x128xf32, #tpu.memory_space<vmem>>, %arg4: memref<128x128xf32, #tpu.memory_space<vmem>>, %arg5: memref<1x128xf32, #tpu.memory_space<vmem>>, %arg6: memref<128x128xf32, #tpu.memory_space<vmem>>, %arg7: memref<1x128xf32, #tpu.memory_space<vmem>>, %arg8: memref<8x8xf32, #tpu.memory_space<vmem>>) attributes {dimension_semantics = [#tpu.dimension_semantics<parallel>], iteration_bounds = array<i64: 1>, scalar_prefetch = 0 : i64, scratch_operands = 0 : i64, tpu.core_type = #tpu.core_type<tc>, window_params = [{transform_indices = @transform_0, window_bounds = array<i64: 8, 32>}, {pipeline_mode = #tpu.pipeline_mode<synchronous>, transform_indices = @transform_1, window_bounds = array<i64: 32, 128>}, {pipeline_mode = #tpu.pipeline_mode<synchronous>, transform_indices = @transform_2, window_bounds = array<i64: 1, 128>}, {pipeline_mode = #tpu.pipeline_mode<synchronous>, transform_indices = @transform_3, window_bounds = array<i64: 128, 128>}, {pipeline_mode = #tpu.pipeline_mode<synchronous>, transform_indices = @transform_4, window_bounds = array<i64: 1, 128>}, {pipeline_mode = #tpu.pipeline_mode<synchronous>, transform_indices = @transform_5, window_bounds = array<i64: 128, 128>}, {pipeline_mode = #tpu.pipeline_mode<synchronous>, transform_indices = @transform_6, window_bounds = array<i64: 1, 128>}, {transform_indices = @transform_7, window_bounds = array<i64: 8, 8>}]} {
    %c0 = arith.constant 0 : index
    %c0_0 = arith.constant 0 : index
    %0 = vector.load %arg1[%c0, %c0_0] : memref<8x32xf32, #tpu.memory_space<vmem>>, vector<8x32xf32>
    %c0_1 = arith.constant 0 : index
    %c0_2 = arith.constant 0 : index
    %1 = vector.load %arg2[%c0_1, %c0_2] : memref<32x128xf32, #tpu.memory_space<vmem>>, vector<32x128xf32>
    %cst = arith.constant dense<0.000000e+00> : vector<8x128xf32>
    %2 = tpu.matmul %0, %1, %cst {dimension_numbers = #tpu.dot_dimension_numbers<[1], [0], [0], [1], [0, 0, 1, 1], [], []>} : vector<8x32xf32>, vector<32x128xf32>, vector<8x128xf32> -> vector<8x128xf32>
    %c0_3 = arith.constant 0 : index
    %c0_4 = arith.constant 0 : index
    %3 = vector.load %arg3[%c0_3, %c0_4] : memref<1x128xf32, #tpu.memory_space<vmem>>, vector<1x128xf32>
    %4 = vector.broadcast %3 : vector<1x128xf32> to vector<8x128xf32>
    %5 = arith.addf %2, %4 : vector<8x128xf32>
    %cst_5 = arith.constant 0.000000e+00 : f32
    %6 = vector.broadcast %cst_5 : f32 to vector<8x128xf32>
    %7 = arith.cmpf ogt, %5, %6 : vector<8x128xf32>
    %cst_6 = arith.constant 0.000000e+00 : f32
    %8 = vector.broadcast %cst_6 : f32 to vector<8x128xf32>
    %9 = arith.minimumf %5, %8 : vector<8x128xf32>
    %10 = math.exp %9 : vector<8x128xf32>
    %cst_7 = arith.constant 1.000000e+00 : f32
    %11 = vector.broadcast %cst_7 : f32 to vector<8x128xf32>
    %12 = arith.subf %10, %11 : vector<8x128xf32>
    %13 = arith.select %7, %5, %12 : vector<8x128xi1>, vector<8x128xf32>
    %c0_8 = arith.constant 0 : index
    %c0_9 = arith.constant 0 : index
    %14 = vector.load %arg4[%c0_8, %c0_9] : memref<128x128xf32, #tpu.memory_space<vmem>>, vector<128x128xf32>
    %cst_10 = arith.constant dense<0.000000e+00> : vector<8x128xf32>
    %15 = tpu.matmul %13, %14, %cst_10 {dimension_numbers = #tpu.dot_dimension_numbers<[1], [0], [0], [1], [0, 0, 1, 1], [], []>} : vector<8x128xf32>, vector<128x128xf32>, vector<8x128xf32> -> vector<8x128xf32>
    %c0_11 = arith.constant 0 : index
    %c0_12 = arith.constant 0 : index
    %16 = vector.load %arg5[%c0_11, %c0_12] : memref<1x128xf32, #tpu.memory_space<vmem>>, vector<1x128xf32>
    %17 = vector.broadcast %16 : vector<1x128xf32> to vector<8x128xf32>
    %18 = arith.addf %15, %17 : vector<8x128xf32>
    %cst_13 = arith.constant 0.000000e+00 : f32
    %19 = vector.broadcast %cst_13 : f32 to vector<8x128xf32>
    %20 = arith.cmpf ogt, %18, %19 : vector<8x128xf32>
    %cst_14 = arith.constant 0.000000e+00 : f32
    %21 = vector.broadcast %cst_14 : f32 to vector<8x128xf32>
    %22 = arith.minimumf %18, %21 : vector<8x128xf32>
    %23 = math.exp %22 : vector<8x128xf32>
    %cst_15 = arith.constant 1.000000e+00 : f32
    %24 = vector.broadcast %cst_15 : f32 to vector<8x128xf32>
    %25 = arith.subf %23, %24 : vector<8x128xf32>
    %26 = arith.select %20, %18, %25 : vector<8x128xi1>, vector<8x128xf32>
    %c0_16 = arith.constant 0 : index
    %c0_17 = arith.constant 0 : index
    %27 = vector.load %arg6[%c0_16, %c0_17] : memref<128x128xf32, #tpu.memory_space<vmem>>, vector<128x128xf32>
    %cst_18 = arith.constant dense<0.000000e+00> : vector<8x128xf32>
    %28 = tpu.matmul %26, %27, %cst_18 {dimension_numbers = #tpu.dot_dimension_numbers<[1], [0], [0], [1], [0, 0, 1, 1], [], []>} : vector<8x128xf32>, vector<128x128xf32>, vector<8x128xf32> -> vector<8x128xf32>
    %c0_19 = arith.constant 0 : index
    %c0_20 = arith.constant 0 : index
    %29 = vector.load %arg7[%c0_19, %c0_20] : memref<1x128xf32, #tpu.memory_space<vmem>>, vector<1x128xf32>
    %30 = vector.broadcast %29 : vector<1x128xf32> to vector<8x128xf32>
    %31 = arith.addf %28, %30 : vector<8x128xf32>
    %32 = vector.extract_strided_slice %31 {offsets = [0, 0], sizes = [8, 8], strides = [1, 1]} : vector<8x128xf32> to vector<8x8xf32>
    %c0_21 = arith.constant 0 : index
    %c0_22 = arith.constant 0 : index
    %33 = vector.load %arg8[%c0_21, %c0_22] : memref<8x8xf32, #tpu.memory_space<vmem>>, vector<8x8xf32>
    tpu.vector_store %arg8[%c0_21, %c0_22], %32 {strides = array<i32>} : memref<8x8xf32, #tpu.memory_space<vmem>>, vector<8x8xf32>,
    return
  }
  func.func @transform_0(%arg0: i32) -> (i32, i32) {
    %c0_i32 = arith.constant 0 : i32
    %c0_i32_0 = arith.constant 0 : i32
    return %arg0, %c0_i32 : i32, i32
  }
  func.func @transform_1(%arg0: i32) -> (i32, i32) {
    %c0_i32 = arith.constant 0 : i32
    %c0_i32_0 = arith.constant 0 : i32
    %c0_i32_1 = arith.constant 0 : i32
    return %c0_i32, %c0_i32_0 : i32, i32
  }
  func.func @transform_2(%arg0: i32) -> (i32, i32) {
    %c0_i32 = arith.constant 0 : i32
    %c0_i32_0 = arith.constant 0 : i32
    %c0_i32_1 = arith.constant 0 : i32
    return %c0_i32, %c0_i32_0 : i32, i32
  }
  func.func @transform_3(%arg0: i32) -> (i32, i32) {
    %c0_i32 = arith.constant 0 : i32
    %c0_i32_0 = arith.constant 0 : i32
    %c0_i32_1 = arith.constant 0 : i32
    return %c0_i32, %c0_i32_0 : i32, i32
  }
  func.func @transform_4(%arg0: i32) -> (i32, i32) {
    %c0_i32 = arith.constant 0 : i32
    %c0_i32_0 = arith.constant 0 : i32
    %c0_i32_1 = arith.constant 0 : i32
    return %c0_i32, %c0_i32_0 : i32, i32
  }
  func.func @transform_5(%arg0: i32) -> (i32, i32) {
    %c0_i32 = arith.constant 0 : i32
    %c0_i32_0 = arith.constant 0 : i32
    %c0_i32_1 = arith.constant 0 : i32
    return %c0_i32, %c0_i32_0 : i32, i32
  }
  func.func @transform_6(%arg0: i32) -> (i32, i32) {
    %c0_i32 = arith.constant 0 : i32
    %c0_i32_0 = arith.constant 0 : i32
    %c0_i32_1 = arith.constant 0 : i32
    return %c0_i32, %c0_i32_0 : i32, i32
  }
  func.func @transform_7(%arg0: i32) -> (i32, i32) {
    %c0_i32 = arith.constant 0 : i32
    %c0_i32_0 = arith.constant 0 : i32
    return %arg0, %c0_i32 : i32, i32
  }
}

</mosaic_0001>

<bundles_post_ra>
// kernel: _actor_call.1
= control target key start
LH: loop header
LB: loop body
LE: loop exit
PB: predicated region body
PF: predicated region fallthrough
CT: control target
= control target key end

     0   :  { %12 = vsyncpa [#allocation3], 0  ;;  %s754_s0 = inlined_call_operand.hbm [shape: f32[8,32], index: 0, kind: input, shape index: {}]   ;;  %s755_s1 = inlined_call_operand.hbm [shape: f32[32,128], index: 1, kind: input, shape index: {}]   ;;  %s756_s2 = inlined_call_operand.vmem [shape: f32[1,128], index: 2, kind: input, shape index: {}]   ;;  %s757_s3 = inlined_call_operand.hbm [shape: f32[128,128], index: 3, kind: input, shape index: {}]   ;;  %s758_s4 = inlined_call_operand.vmem [shape: f32[1,128], index: 4, kind: input, shape index: {}]   ;;  %s759_s5 = inlined_call_operand.hbm [shape: f32[128,128], index: 5, kind: input, shape index: {}]   ;;  %s760_s6 = inlined_call_operand.vmem [shape: f32[1,128], index: 6, kind: input, shape index: {}]   ;;  %s761_s7 = inlined_call_operand.hbm [shape: f32[8,8], index: 7, kind: output, shape index: {}]  }
   0x1   :  { %13 = vsyncpa [#allocation6], 0 }
   0x2   :  { %14 = vsyncpa [#allocation9], 0 }
   0x3   :  { %15 = vsyncpa [#allocation4], 0  ;;  %s630_s24 = smov [#allocation5]  }
   0x4   :  { %s31_s25 = sshll.u32 %s630_s24, 4  ;;  %s32_s25 = int_to_ptr.vmem [resolvable:$true] %s31_s25 }
   0x5   :  { %s530_s26 = scalar_lea.vmem %s32_s25, 512  ;;  %p535_p1 = scmp.lt.s32.totalorder %s32_s25, %s32_s25 }
   0x6   :  { %p531_p0 = scmp.ne.s32.totalorder %s32_s25, %s530_s26  ;;  %p536_p2 = scmp.lt.s32.totalorder %s530_s26, %s530_s26 }
   0x8   :  { %p537_p3 = por %p536_p2, %p535_p1 }
   0xa   :  { %p538_p4 = pnand %p537_p3, %p531_p0 }
   0xc   :  { %541 = shalt.err (!%p538_p4)
}
   0xd   :  { %s631_s27 = smov 128   ;;  %s632_s28 = smov 8  }
   0xe   :  { %37 = dma.hbm_to_vmem [thread:$0]  %s755_s1, 512, %s32_s25, [#allocation6], %s631_s27, %s631_s27, %s632_s28  }
   0xf   :  { %s633_s8 = smov [#allocation2]   ;;  %s634_s10 = smov [#allocation7]  }
  0x10   :  { %s22_s9 = sshll.u32 %s633_s8, 4  ;;  %s45_s11 = sshll.u32 %s634_s10, 4  ;;  %s23_s9 = int_to_ptr.vmem [resolvable:$true] %s22_s9  ;;  %s46_s11 = int_to_ptr.vmem [resolvable:$true] %s45_s11 }
  0x11   :  { %s550_s12 = scalar_lea.vmem %s23_s9, 128  ;;  %p555_p6 = scmp.lt.s32.totalorder %s23_s9, %s23_s9 }
  0x12   :  { %p551_p5 = scmp.ne.s32.totalorder %s23_s9, %s550_s12  ;;  %p556_p7 = scmp.lt.s32.totalorder %s550_s12, %s550_s12 }
  0x14   :  { %p557_p8 = por %p556_p7, %p555_p6 }
  0x16   :  { %p558_p9 = pnand %p557_p8, %p551_p5 }
  0x18   :  { %561 = shalt.err (!%p558_p9)
}
  0x19   :  { %25 = dma.hbm_to_vmem [thread:$0]  %s754_s0, 128, %s23_s9, [#allocation3]  }
  0x1a   :  { %s570_s15 = scalar_lea.vmem %s46_s11, 2048  ;;  %p575_p11 = scmp.lt.s32.totalorder %s46_s11, %s46_s11 }
  0x1b   :  { %p571_p10 = scmp.ne.s32.totalorder %s46_s11, %s570_s15  ;;  %p576_p12 = scmp.lt.s32.totalorder %s570_s15, %s570_s15 }
  0x1d   :  { %p577_p13 = por %p576_p12, %p575_p11 }
  0x1f   :  { %p578_p0 = pnand %p577_p13, %p571_p10 }
  0x21   :  { %581 = shalt.err (!%p578_p0)
}
  0x22   :  { %51 = dma.hbm_to_vmem [thread:$0]  %s757_s3, 2048, %s46_s11, [#allocation6], %s631_s27, %s631_s27, %s632_s28  }
  0x23   :  { %s635_s17 = smov [#allocation8]  }
  0x24   :  { %s59_s18 = sshll.u32 %s635_s17, 4  ;;  %s60_s18 = int_to_ptr.vmem [resolvable:$true] %s59_s18 }
  0x25   :  { %s590_s19 = scalar_lea.vmem %s60_s18, 2048  ;;  %p595_p2 = scmp.lt.s32.totalorder %s60_s18, %s60_s18 }
  0x26   :  { %p591_p1 = scmp.ne.s32.totalorder %s60_s18, %s590_s19  ;;  %p596_p3 = scmp.lt.s32.totalorder %s590_s19, %s590_s19 }
  0x28   :  { %p597_p4 = por %p596_p3, %p595_p2 }
  0x2a   :  { %p598_p5 = pnand %p597_p4, %p591_p1 }
  0x2c   :  { %601 = shalt.err (!%p598_p5)
}
  0x2d   :  { %65 = dma.hbm_to_vmem [thread:$0]  %s759_s5, 2048, %s60_s18, [#allocation9], %s631_s27, %s631_s27, %s632_s28  }
  0x2e   :  { %622 = dma.done.wait [#allocation3], 128  }
  0x2f   :  { %623 = vsyncadd [#allocation3], 4294967168 }
  0x30   :  { %624 = dma.done.wait [#allocation6], 2560  }
  0x31   :  { %625 = vsyncadd [#allocation6], 4294964736 }
  0x32   :  { %626 = dma.done.wait [#allocation9], 2048  }
  0x33   :  { %627 = vsyncadd [#allocation9], 4294965248  ;;  %v636_v0 = vmov 0.0   ;;  %vm637_vm0 = vmmov 0   ;;  %v84_v1 = vld [vmem:[#allocation5 + $0x18] sm:$0xff]  ;;  %v83_v2 = vld [vmem:[#allocation5 + $0x10] sm:$0xff] }
  0x34   :  { %428 = vmatprep.subr.mxu0 %v636_v0  ;;  %436 = vmatprep.mubr.msk.f32.mxu0 %vm637_vm0, %v636_v0  ;;  %v187_v3 = vld [vmem:[#allocation7 + $0x78] sm:$0xff]  ;;  %v82_v4 = vld [vmem:[#allocation5 + $0x8] sm:$0xff]  ;;  %v186_v5 = vld [vmem:[#allocation7 + $0x70] sm:$0xff]  ;;  %vm92_vm1 = vcmask 261120   ;;  %s638_s24 = smov [#allocation10]   ;;  %vm364_vm4 = vcmask 64512  }
  0x35   :  { %439 = vmatprep.subr.mxu1 %v636_v0  ;;  %471 = vmatprep.mubr.msk.f32.mxu1 %vm637_vm0, %v636_v0  ;;  %v185_v6 = vld [vmem:[#allocation7 + $0x68] sm:$0xff]  ;;  %v81_v7 = vld [vmem:[#allocation5] sm:$0xff]  ;;  %v80_v8 = vld [vmem:[#allocation2] sm:$0xff]  ;;  %s372_s25 = sshll.u32 %s638_s24, 4  ;;  %s373_s25 = int_to_ptr.vmem [resolvable:$true] %s372_s25 }
  0x36   :  { %429 = vmatpush3.msra.mxu0 %v84_v1  ;;  %440 = vmatpush3.msra.mxu1 %v187_v3  ;;  %v184_v9 = vld [vmem:[#allocation7 + $0x60] sm:$0xff]  ;;  %v183_v10 = vld [vmem:[#allocation7 + $0x58] sm:$0xff]  ;;  %v182_v11 = vld [vmem:[#allocation7 + $0x50] sm:$0xff]  ;;  %p607_p7 = scmp.lt.s32.totalorder %s373_s25, %s373_s25 }
  0x37   :  { %430 = vmatprep.subr.mxu0 %v636_v0  ;;  %441 = vmatprep.subr.mxu1 %v636_v0  ;;  %v181_v12 = vld [vmem:[#allocation7 + $0x48] sm:$0xff]  ;;  %v180_v13 = vld [vmem:[#allocation7 + $0x40] sm:$0xff]  ;;  %v179_v14 = vld [vmem:[#allocation7 + $0x38] sm:$0xff] }
  0x38   :  { %431 = vmatpush3.msra.mxu0 %v83_v2  ;;  %442 = vmatpush3.msra.mxu1 %v186_v5  ;;  %v178_v15 = vld [vmem:[#allocation7 + $0x30] sm:$0xff]  ;;  %v177_v16 = vld [vmem:[#allocation7 + $0x28] sm:$0xff]  ;;  %v176_v17 = vld [vmem:[#allocation7 + $0x20] sm:$0xff] }
  0x39   :  { %432 = vmatprep.subr.mxu0 %v636_v0  ;;  %443 = vmatprep.subr.mxu1 %v636_v0  ;;  %v175_v18 = vld [vmem:[#allocation7 + $0x18] sm:$0xff]  ;;  %v174_v19 = vld [vmem:[#allocation7 + $0x10] sm:$0xff]  ;;  %v173_v20 = vld [vmem:[#allocation7 + $0x8] sm:$0xff] }
  0x3a   :  { %433 = vmatpush3.msra.mxu0 %v82_v4  ;;  %444 = vmatpush3.msra.mxu1 %v185_v6  ;;  %v172_v21 = vld [vmem:[#allocation7] sm:$0xff]  ;;  %v286_v22 = vld [vmem:[#allocation8 + $0x78] sm:$0xff]  ;;  %v285_v23 = vld [vmem:[#allocation8 + $0x70] sm:$0xff] }
  0x3b   :  { %434 = vmatprep.subr.mxu0 %v636_v0  ;;  %445 = vmatprep.subr.mxu1 %v636_v0  ;;  %v284_v24 = vld [vmem:[#allocation8 + $0x68] sm:$0xff]  ;;  %v283_v25 = vld [vmem:[#allocation8 + $0x60] sm:$0xff]  ;;  %v383_v26 = vld [vmem:[%s756_s2] ss:$0 sm:$0xff] }
  0x3c   :  { %435 = vmatpush3.msra.mxu0 %v81_v7  ;;  %446 = vmatpush3.msra.mxu1 %v184_v9  ;;  %v282_v35 = vld [vmem:[#allocation8 + $0x58] sm:$0xff]  ;;  %v281_v36 = vld [vmem:[#allocation8 + $0x50] sm:$0xff]  ;;  %v280_v37 = vld [vmem:[#allocation8 + $0x48] sm:$0xff] }
  0x3d   :  { %437 = vmatmul.mubr.msk.f32.vlgmr.msra.gmra.mxu0 %vm92_vm1, %v80_v8  ;;  %447 = vmatprep.subr.mxu1 %v636_v0  ;;  %v279_v38 = vld [vmem:[#allocation8 + $0x40] sm:$0xff]  ;;  %v278_v39 = vld [vmem:[#allocation8 + $0x38] sm:$0xff]  ;;  %v277_v40 = vld [vmem:[#allocation8 + $0x30] sm:$0xff] }
  0x3e   :  { %474 = vmatprep.subr.mxu0 %v636_v0  ;;  %506 = vmatprep.mubr.msk.f32.mxu0 %vm637_vm0, %v636_v0  ;;  %v276_v41 = vld [vmem:[#allocation8 + $0x28] sm:$0xff]  ;;  %v275_v42 = vld [vmem:[#allocation8 + $0x20] sm:$0xff]  ;;  %v274_v43 = vld [vmem:[#allocation8 + $0x18] sm:$0xff] }
  0x3f   :  { %448 = vmatpush3.msra.mxu1 %v183_v10  ;;  %475 = vmatpush3.msra.mxu0 %v286_v22  ;;  %v273_v44 = vld [vmem:[#allocation8 + $0x10] sm:$0xff]  ;;  %v272_v45 = vld [vmem:[#allocation8 + $0x8] sm:$0xff]  ;;  %v271_v46 = vld [vmem:[#allocation8] sm:$0xff] }
  0x40   :  { %449 = vmatprep.subr.mxu1 %v636_v0  ;;  %476 = vmatprep.subr.mxu0 %v636_v0  ;;  %v386_v47 = vld [vmem:[%s758_s4] ss:$0 sm:$0xff]  ;;  %s602_s4 = scalar_lea.vmem %s373_s25, 128 }
  0x41   :  { %450 = vmatpush3.msra.mxu1 %v182_v11  ;;  %477 = vmatpush3.msra.mxu0 %v285_v23  ;;  %v388_v56 = vld [vmem:[%s760_s6] ss:$0 sm:$0xff]  ;;  %p603_p6 = scmp.ne.s32.totalorder %s373_s25, %s602_s4  ;;  %p608_p8 = scmp.lt.s32.totalorder %s602_s4, %s602_s4 }
  0x42   :  { %451 = vmatprep.subr.mxu1 %v636_v0  ;;  %478 = vmatprep.subr.mxu0 %v636_v0 }
  0x43   :  { %452 = vmatpush3.msra.mxu1 %v181_v12  ;;  %479 = vmatpush3.msra.mxu0 %v284_v24  ;;  %p609_p9 = por %p608_p8, %p607_p7 }
  0x44   :  { %453 = vmatprep.subr.mxu1 %v636_v0  ;;  %480 = vmatprep.subr.mxu0 %v636_v0 }
  0x45   :  { %454 = vmatpush3.msra.mxu1 %v180_v13  ;;  %481 = vmatpush3.msra.mxu0 %v283_v25  ;;  %p610_p10 = pnand %p609_p9, %p603_p6 }
  0x46   :  { %455 = vmatprep.subr.mxu1 %v636_v0  ;;  %482 = vmatprep.subr.mxu0 %v636_v0 }
  0x47   :  { %456 = vmatpush3.msra.mxu1 %v179_v14  ;;  %483 = vmatpush3.msra.mxu0 %v282_v35 }
  0x48   :  { %457 = vmatprep.subr.mxu1 %v636_v0  ;;  %484 = vmatprep.subr.mxu0 %v636_v0 }
  0x49   :  { %458 = vmatpush3.msra.mxu1 %v178_v15  ;;  %485 = vmatpush3.msra.mxu0 %v281_v36 }
  0x4a   :  { %459 = vmatprep.subr.mxu1 %v636_v0  ;;  %486 = vmatprep.subr.mxu0 %v636_v0 }
  0x4b   :  { %460 = vmatpush3.msra.mxu1 %v177_v16  ;;  %487 = vmatpush3.msra.mxu0 %v280_v37 }
  0x4c   :  { %461 = vmatprep.subr.mxu1 %v636_v0  ;;  %488 = vmatprep.subr.mxu0 %v636_v0 }
  0x4d   :  { %462 = vmatpush3.msra.mxu1 %v176_v17  ;;  %489 = vmatpush3.msra.mxu0 %v279_v38 }
  0x4e   :  { %463 = vmatprep.subr.mxu1 %v636_v0  ;;  %490 = vmatprep.subr.mxu0 %v636_v0 }
  0x4f   :  { %464 = vmatpush3.msra.mxu1 %v175_v18  ;;  %491 = vmatpush3.msra.mxu0 %v278_v39 }
  0x50   :  { %465 = vmatprep.subr.mxu1 %v636_v0  ;;  %492 = vmatprep.subr.mxu0 %v636_v0 }
  0x51   :  { %466 = vmatpush3.msra.mxu1 %v174_v19  ;;  %493 = vmatpush3.msra.mxu0 %v277_v40 }
  0x52   :  { %467 = vmatprep.subr.mxu1 %v636_v0  ;;  %494 = vmatprep.subr.mxu0 %v636_v0 }
  0x53   :  { %468 = vmatpush3.msra.mxu1 %v173_v20  ;;  %495 = vmatpush3.msra.mxu0 %v276_v41 }
  0x54   :  { %469 = vmatprep.subr.mxu1 %v636_v0  ;;  %496 = vmatprep.subr.mxu0 %v636_v0 }
  0x55   :  { %470 = vmatpush3.msra.mxu1 %v172_v21  ;;  %497 = vmatpush3.msra.mxu0 %v275_v42 }
  0x56   :  { %498 = vmatprep.subr.mxu0 %v636_v0 }
  0x57   :  { %499 = vmatpush3.msra.mxu0 %v274_v43 }
  0x58   :  { %500 = vmatprep.subr.mxu0 %v636_v0 }
  0x59   :  { %501 = vmatpush3.msra.mxu0 %v273_v44 }
  0x5a   :  { %502 = vmatprep.subr.mxu0 %v636_v0 }
  0x5b   :  { %503 = vmatpush3.msra.mxu0 %v272_v45 }
  0x5c   :  { %504 = vmatprep.subr.mxu0 %v636_v0 }
  0x5d   :  { %505 = vmatpush3.msra.mxu0 %v271_v46 }
  0xfd   :  { %v162_v27 = vpop.f32.mrf.mxu0 }
  0xfe   :  { %v163_v28 = vadd.f32 %v383_v26, %v162_v27 }
  0xff   :  { %v438_v29 = vpop.f32.mrf.mxu0 }
 0x100   :  { %v167_v30 = vmin.f32 %v163_v28, 0.0  ;;  %vm166_vm2 = vcmp.gt.f32.partialorder %v163_v28, 0.0 }
 0x102   :  { %v168_v31 = vmul.f32 1.442695, %v167_v30 }
 0x104   :  { %518 = vpow2.f32 %v168_v31 }
 0x111   :  { %v519_v32 = vpop.eup %518 }
 0x112   :  { %v385_v33 = vadd.f32 -1.0, %v519_v32 }
 0x114   :  { %v171_v34 = vsel %vm166_vm2, %v163_v28, %v385_v33 }
 0x115   :  { %472 = vmatmul.mubr.f32.vlgmr.msra.gmra.mxu1 %v171_v34 }
 0x1d5   :  { %v261_v48 = vpop.f32.mrf.mxu1 }
 0x1d6   :  { %v262_v49 = vadd.f32 %v386_v47, %v261_v48 }
 0x1d7   :  { %v473_v50 = vpop.f32.mrf.mxu1 }
 0x1d8   :  { %v266_v51 = vmin.f32 %v262_v49, 0.0  ;;  %vm265_vm3 = vcmp.gt.f32.partialorder %v262_v49, 0.0 }
 0x1da   :  { %v267_v52 = vmul.f32 1.442695, %v266_v51 }
 0x1dc   :  { %520 = vpow2.f32 %v267_v52 }
 0x1e9   :  { %v521_v53 = vpop.eup %520 }
 0x1ea   :  { %v387_v54 = vadd.f32 -1.0, %v521_v53 }
 0x1ec   :  { %v270_v55 = vsel %vm265_vm3, %v262_v49, %v387_v54 }
 0x1ed   :  { %507 = vmatmul.mubr.f32.vlgmr.msra.gmra.mxu0 %v270_v55 }
 0x2ad   :  { %v360_v57 = vpop.f32.mrf.mxu0 }
 0x2ae   :  { %v361_v58 = vadd.f32 %v388_v56, %v360_v57 }
 0x2af   :  { %v508_v59 = vpop.f32.mrf.mxu0 }
 0x2b0   :  { %365 = vst.msk [vmem:[#allocation10] sm:$0xff] %vm364_vm4, %v361_v58 }
 0x2b1   :  { %613 = shalt.err (!%p610_p10)
}
 0x2b2   :  { %375 = dma.vmem_to_hbm [thread:$0]  %s373_s25, 128, %s761_s7, [#allocation4]  }
 0x2b3   :  { %628 = dma.done.wait [#allocation4], 128  }
 0x2b4   :  { %629 = vsyncadd [#allocation4], 4294967168 }
 0x2b5   :  { %379 = vsyncpa [#allocation3], 1 }
 0x2b6   :  { %380 = vsyncpa [#allocation6], 1 }
 0x2b7   :  { %381 = vsyncpa [#allocation9], 1 }
 0x2b8   :  { %382 = vsyncpa [#allocation4], 1 }

</bundles_post_ra>
